<compile_context>
chip_gen: v7x
topology: tpu7x:2x2x1
jax: 0.10.0
libtpu: 0.0.40
codegen_flags: <defaults>
</compile_context>

<pallas_src>
import functools

import jax
import jax.numpy as jnp
import numpy as np
from jax import lax
from jax.experimental import pallas as pl
from jax.experimental.pallas import tpu as pltpu

LANES = 128
KEY_BITS = 32                  # int32 key -> 32 bits of bisection total
INT32_MIN = -(2 ** 31)
KEY_LO_INIT = -2139095041      # key(-inf) - 1 -> count(key <= lo) == 0 <  k
KEY_HI_INIT = 2139095040       # key(+inf)     -> count(key <= hi) == n >= k

# Streaming-path tuning (review: 2048-4096-row blocks; P=3 pivots is HBM-bound
# on v5e/v6e and within VALU slack on v7x).
ROW_TILE = 4096                                   # (4096,128) f32 = 2 MiB/block
BITS_PER_PASS = 2                                 # 4-way bisection
N_PIVOTS = (1 << BITS_PER_PASS) - 1               # 3 pivots
N_STREAM_STEPS = -(-KEY_BITS // BITS_PER_PASS)    # ceil(32/2) = 16 passes


def _midpoint(a, b):
    """Overflow-free floor((a + b) / 2) for int32 scalars."""
    return (a & b) + ((a ^ b) >> 1)


def _nested_midpoints(lo, hi, levels):
    """2**levels - 1 interior pivots of [lo, hi] via recursive midpoints."""
    pts = [lo, hi]
    for _ in range(levels):
        nxt = [pts[0]]
        for a, b in zip(pts[:-1], pts[1:]):
            nxt.append(_midpoint(a, b))
            nxt.append(b)
        pts = nxt
    return pts[1:-1]


def _monotone_key(x_f32):
    """int32 key with the same total order as the float32 values (NaNs excluded)."""
    bits = pltpu.bitcast(x_f32, jnp.int32)
    return jnp.where(bits >= 0, bits, jnp.int32(INT32_MIN) - bits)


def _resident_select_kernel(x_ref, key_out_ref, *, k):
    """Whole tensor resident in VMEM: 32 binary-bisection passes in one grid step."""
    def body(_, carry):
        lo, hi = carry
        mid = _midpoint(lo, hi)
        # Re-read / re-key from the VMEM block each pass so no full-size
        # temporary has to stay live across the loop iterations.
        key = _monotone_key(x_ref[...])
        cnt = jnp.sum((key <= mid).astype(jnp.int32))
        ge = cnt >= jnp.int32(k)
        return jnp.where(ge, lo, mid), jnp.where(ge, mid, hi)

    _, hi = lax.fori_loop(0, KEY_BITS, body,
                          (jnp.int32(KEY_LO_INIT), jnp.int32(KEY_HI_INIT)))
    key_out_ref[0] = hi            # exact key of sorted(flat)[k-1]


def _streaming_select_kernel(x_ref, key_out_ref, state, *, k):
    """4-way bisection streamed from HBM.

    grid = (N_STREAM_STEPS, n_row_tiles).  Per step every tile accumulates
    count(key <= pivot_j) for the 3 pivots into SMEM; the last tile shrinks
    [lo, hi] by 2 bits and publishes `hi` (exact after the final step).

    state : SMEM int32[2 + N_PIVOTS] = [lo, hi, cnt_0 .. cnt_{P-1}]
    """
    s = pl.program_id(0)
    t = pl.program_id(1)
    n_tiles = pl.num_programs(1)

    @pl.when(jnp.logical_and(s == 0, t == 0))
    def _():
        state[0] = jnp.int32(KEY_LO_INIT)     # invariant: count(<= lo) <  k
        state[1] = jnp.int32(KEY_HI_INIT)     # invariant: count(<= hi) >= k

    @pl.when(t == 0)
    def _():
        for j in range(N_PIVOTS):
            state[2 + j] = jnp.int32(0)

    lo = state[0]
    hi = state[1]
    pivots = _nested_midpoints(lo, hi, BITS_PER_PASS)   # cheap scalar ops

    key = _monotone_key(x_ref[...])                     # (ROW_TILE, 128) int32
    # TODO(synk): accumulate per-lane partial sums in a VMEM vector and defer
    #             the cross-lane reduce to the last tile (minor at 2 MiB tiles).
    for j in range(N_PIVOTS):
        state[2 + j] = state[2 + j] + jnp.sum((key <= pivots[j]).astype(jnp.int32))

    @pl.when(t == n_tiles - 1)
    def _():
        k_ = jnp.int32(k)
        new_hi = hi
        for j in reversed(range(N_PIVOTS)):   # smallest pivot with count >= k
            new_hi = jnp.where(state[2 + j] >= k_, pivots[j], new_hi)
        new_lo = lo
        for j in range(N_PIVOTS):             # largest pivot with count <  k
            new_lo = jnp.where(state[2 + j] < k_, pivots[j], new_lo)
        state[0] = new_lo
        state[1] = new_hi
        key_out_ref[0] = new_hi               # exact after the final step


def _vmem_budget_bytes():
    """Usable scoped-VMEM budget; generation-aware (v7x has 64 MiB physical)."""
    try:
        cap = getattr(pltpu.get_tpu_info(), "vmem_capacity_bytes", None)
    except Exception:
        cap = None
    if not cap:
        cap = 64 * 1024 * 1024                 # conservative: v7x physical VMEM
    budget = int(cap) * 3 // 4                 # headroom for Mosaic scratch
    return min(max(budget, 32 * 1024 * 1024), 96 * 1024 * 1024)


def hook_scale(x, p=0.9995, gamma=1, *, _force_streaming=False):  # gamma unused
    """Pallas implementation of HookScale.forward.

    Returns (x, scale): x unchanged, scale = the value the PyTorch module
    stores in its `scale` buffer (bit-exact for float32, NaN-free inputs).
    """
    n = int(np.prod(x.shape))
    k = int(n * p)                 # 1-based rank, == torch sort[int(n*p) - 1]
    if k <= 0:
        k = n                      # torch's negative-index wrap -> maximum
    k = min(k, n)

    flat = x.reshape(-1)
    if flat.dtype != jnp.float32:
        # TODO(synk): native bf16 path (16-bit key, 16 passes) avoids this copy.
        flat = flat.astype(jnp.float32)

    budget = _vmem_budget_bytes()
    rows = pl.cdiv(n, LANES)
    bytes_2d = rows * LANES * 4
    # Resident iff the whole tensor (double-buffered by the pipeline) + slack
    # fits the budget (~21 MiB tensors on v7x, ~45 MiB on v5e/v6e).
    resident = (not _force_streaming) and (2 * bytes_2d + (4 << 20) <= budget)

    pad_rows = rows if resident else pl.cdiv(rows, ROW_TILE) * ROW_TILE
    pad = pad_rows * LANES - n
    if pad:
        # +inf pad: key(+inf) is strictly greater than every reachable pivot,
        # so padded slots are never counted -> no in-kernel masking needed.
        flat = jnp.pad(flat, (0, pad), constant_values=float("inf"))
    x2d = flat.reshape(pad_rows, LANES)    # lane-dense; free reshape when pad == 0

    common = dict(out_shape=jax.ShapeDtypeStruct((1,), jnp.int32),
                  out_specs=pl.BlockSpec(memory_space=pltpu.MemorySpace.SMEM))

    if resident:
        key_i32 = pl.pallas_call(
            functools.partial(_resident_select_kernel, k=k),
            grid=(1,),
            in_specs=[pl.BlockSpec((pad_rows, LANES), lambda i: (0, 0))],
            compiler_params=pltpu.CompilerParams(
                dimension_semantics=("arbitrary",),
                vmem_limit_bytes=budget),
            cost_estimate=pl.CostEstimate(
                flops=KEY_BITS * 4 * pad_rows * LANES,
                transcendentals=0,
                bytes_accessed=4 * pad_rows * LANES),
            **common,
        )(x2d)
    else:
        n_tiles = pad_rows // ROW_TILE
        key_i32 = pl.pallas_call(
            functools.partial(_streaming_select_kernel, k=k),
            grid=(N_STREAM_STEPS, n_tiles),
            in_specs=[pl.BlockSpec((ROW_TILE, LANES), lambda s, t: (t, 0))],
            scratch_shapes=[pltpu.SMEM((2 + N_PIVOTS,), jnp.int32)],
            compiler_params=pltpu.CompilerParams(
                # Both axes carry sequential SMEM state.
                # TODO(synk): shard the tile axis across v7x's two TensorCores.
                dimension_semantics=("arbitrary", "arbitrary"),
                vmem_limit_bytes=budget),
            cost_estimate=pl.CostEstimate(
                flops=N_STREAM_STEPS * (3 + 2 * N_PIVOTS) * pad_rows * LANES,
                transcendentals=0,
                bytes_accessed=N_STREAM_STEPS * 4 * pad_rows * LANES),
            **common,
        )(x2d)

    # Invert the monotone key -> float32 bit pattern (exact, O(1) scalar work).
    t_key = key_i32[0]
    bits = jnp.where(t_key >= 0, t_key, jnp.int32(INT32_MIN) - t_key)
    scale = lax.bitcast_convert_type(bits, jnp.float32)
    return x, scale


if __name__ == "__main__":
    key = jax.random.PRNGKey(0)
    # NCHW activation, as a PyTorch conv hook would see it.
    x = jax.random.normal(key, (2, 4, 16, 16), dtype=jnp.float32)
    p = 0.9995

    # Reference (plain JAX sort, mirrors the torch semantics).
    flat_sorted = jnp.sort(x.reshape(-1))
    ref = flat_sorted[int(flat_sorted.shape[0] * p) - 1]

    # Default path (VMEM-resident on real TPUs at this size).
    out, scale = hook_scale(x, p=p)
    out = jax.block_until_ready(out)
    scale = jax.block_until_ready(scale)
    np.testing.assert_array_equal(np.asarray(out), np.asarray(x))
    np.testing.assert_array_equal(np.asarray(scale), np.asarray(ref))

    # Also exercise the HBM-streaming (multi-pivot) kernel so both code paths
    # are verified regardless of which one the device's VMEM budget selects.
    out_s, scale_s = hook_scale(x, p=p, _force_streaming=True)
    scale_s = jax.block_until_ready(scale_s)
    np.testing.assert_array_equal(np.asarray(scale_s), np.asarray(ref))

    print("KERNEL_OK")
</pallas_src>

<mosaic_0001>
module attributes {stable_mosaic.version = 11 : i64} {
  func.func @_resident_select_kernel(%arg0: i32, %arg1: memref<16x128xf32, #tpu.memory_space<vmem>>, %arg2: memref<1xi32, #tpu.memory_space<smem>>) attributes {dimension_semantics = [#tpu.dimension_semantics<arbitrary>], iteration_bounds = array<i64: 1>, scalar_prefetch = 0 : i64, scratch_operands = 0 : i64, tpu.core_type = #tpu.core_type<tc>, window_params = [{pipeline_mode = #tpu.pipeline_mode<synchronous>, transform_indices = @transform_0, window_bounds = array<i64: 16, 128>}, {transform_indices = @transform_1, window_bounds = array<i64: 1>}]} {
    %c-2139095041_i32 = arith.constant -2139095041 : i32
    %c2139095040_i32 = arith.constant 2139095040 : i32
    %c0_i32 = arith.constant 0 : i32
    %c32_i32 = arith.constant 32 : i32
    %0 = arith.addi %c0_i32, %c32_i32 : i32
    %c1_i32 = arith.constant 1 : i32
    %1:2 = scf.for %arg3 = %c0_i32 to %0 step %c1_i32 iter_args(%arg4 = %c-2139095041_i32, %arg5 = %c2139095040_i32) -> (i32, i32)  : i32 {
      %3 = arith.andi %arg4, %arg5 : i32
      %4 = arith.xori %arg4, %arg5 : i32
      %c1_i32_0 = arith.constant 1 : i32
      %5 = arith.shrsi %4, %c1_i32_0 : i32
      %6 = arith.addi %3, %5 : i32
      %c0_1 = arith.constant 0 : index
      %c0_2 = arith.constant 0 : index
      %7 = vector.load %arg1[%c0_1, %c0_2] : memref<16x128xf32, #tpu.memory_space<vmem>>, vector<16x128xf32>
      %8 = tpu.bitcast %7 : vector<16x128xf32> -> vector<16x128xi32>
      %c0_i32_3 = arith.constant 0 : i32
      %9 = vector.broadcast %c0_i32_3 : i32 to vector<16x128xi32>
      %10 = arith.cmpi sge, %8, %9 : vector<16x128xi32>
      %c-2147483648_i32 = arith.constant -2147483648 : i32
      %11 = vector.broadcast %c-2147483648_i32 : i32 to vector<16x128xi32>
      %12 = arith.subi %11, %8 : vector<16x128xi32>
      %13 = arith.select %10, %8, %12 : vector<16x128xi1>, vector<16x128xi32>
      %14 = vector.broadcast %6 : i32 to vector<16x128xi32>
      %15 = arith.cmpi sle, %13, %14 : vector<16x128xi32>
      %16 = arith.extui %15 : vector<16x128xi1> to vector<16x128xi32>
      %17 = vector.shape_cast %16 : vector<16x128xi32> to vector<1x16x128xi32>
      %cst = arith.constant dense<0> : vector<1xi32>
      %18 = vector.multi_reduction <add>, %17, %cst [1, 2] : vector<1x16x128xi32> to vector<1xi32>
      %19 = vector.shape_cast %18 : vector<1xi32> to vector<1x1x1xi32>
      %20 = vector.extract %19[0, 0, 0] : i32 from vector<1x1x1xi32>
      %c2046_i32 = arith.constant 2046 : i32
      %21 = arith.cmpi sge, %20, %c2046_i32 : i32
      %22 = arith.select %21, %arg4, %6 : i32
      %23 = arith.select %21, %6, %arg5 : i32
      scf.yield %22, %23 : i32, i32
    }
    %c0 = arith.constant 0 : index
    %2 = memref.load %arg2[%c0] : memref<1xi32, #tpu.memory_space<smem>>
    memref.store %1#1, %arg2[%c0] : memref<1xi32, #tpu.memory_space<smem>>
    return
  }
  func.func @transform_0(%arg0: i32) -> (i32, i32) {
    %c0_i32 = arith.constant 0 : i32
    %c0_i32_0 = arith.constant 0 : i32
    %c0_i32_1 = arith.constant 0 : i32
    return %c0_i32, %c0_i32_0 : i32, i32
  }
  func.func @transform_1(%arg0: i32) -> i32 {
    %c0_i32 = arith.constant 0 : i32
    %c0_i32_0 = arith.constant 0 : i32
    return %c0_i32 : i32
  }
}

</mosaic_0001>

<bundles_post_ra>
// kernel: tpu_custom_call.1
= control target key start
LH: loop header
LB: loop body
LE: loop exit
PB: predicated region body
PF: predicated region fallthrough
CT: control target
= control target key end

     0   :  { %6 = vsyncpa [#allocation3], 0  ;;  %s263_s0 = inlined_call_operand.hbm [shape: f32[16,128], index: 0, kind: input, shape index: {}]   ;;  %s264_s1 = inlined_call_operand.hbm [shape: s32[1], index: 1, kind: output, shape index: {}]  }
   0x1   :  { %7 = vsyncpa [#allocation4], 0  ;;  %s191_s6 = smov [#allocation2]   ;;  %s131_s10 = scalar_lea.hbm %s263_s0, 256 }
   0x2   :  { %s13_s7 = sshll.u32 %s191_s6, 4  ;;  %p132_p0 = scmp.ne.s32.totalorder %s263_s0, %s131_s10  ;;  %s14_s7 = int_to_ptr.vmem [resolvable:$true] %s13_s7 }
   0x3   :  { %p135_p1 = scmp.lt.u32.totalorder %s131_s10, %s263_s0 }
   0x5   :  { %p137_p2 = pnand %p135_p1, %p132_p0 }
   0x7   :  { %140 = shalt.err (!%p137_p2)
}
   0x8   :  { %s141_s15 = scalar_lea.vmem %s14_s7, 256  ;;  %p146_p4 = scmp.lt.s32.totalorder %s14_s7, %s14_s7 }
   0x9   :  { %p142_p3 = scmp.ne.s32.totalorder %s14_s7, %s141_s15  ;;  %p147_p5 = scmp.lt.s32.totalorder %s141_s15, %s141_s15 }
   0xb   :  { %p148_p6 = por %p147_p5, %p146_p4 }
   0xd   :  { %p149_p7 = pnand %p148_p6, %p142_p3 }
   0xf   :  { %152 = shalt.err (!%p149_p7)
}
  0x10   :  { %s192_s16 = smov 128   ;;  %s193_s17 = smov 8  }
  0x11   :  { %19 = dma.hbm_to_vmem [thread:$0]  %s263_s0, 256, %s14_s7, [#allocation3], %s192_s16, %s192_s16, %s193_s17  }
  0x12   :  { %175 = dma.done.wait [#allocation3], 256  }
  0x13   :  { %176 = vsyncadd [#allocation3], 4294967040  ;;  %s218_s20 = smov 2139095040   ;;  %s220_s21 = smov 2155872255  }
  0x14   :  { %s222_s22 = smov 0  }
  0x15 LB: > { %v35_v0 = vld [vmem:[#allocation2] sm:$0xff]  ;;  %v36_v1 = vld [vmem:[#allocation2 + $0x8] sm:$0xff]  ;;  %s31_s0 = sand.u32 %s181_s20, %s185_s21  ;;  %s32_s23 = sxor.u32 %s181_s20, %s185_s21  ;;  %v194_v7 = vmov 0   ;;  %s189_s22 = sphi %s222_s22, %s28_s22   ;;  %s185_s21 = sphi %s220_s21, %s267_s21   ;;  %s181_s20 = sphi %s218_s20, %s265_s20  }
  0x16   : > { %vm39_vm0 = vcmp.ge.s32.totalorder %v35_v0, 0  ;;  %vm40_vm1 = vcmp.ge.s32.totalorder %v36_v1, 0  ;;  %v41_v2 = vsub.s32 2147483648, %v35_v0  ;;  %v42_v3 = vsub.s32 2147483648, %v36_v1  ;;  %s33_s24 = sshra.s32 %s32_s23, 1  ;;  %s28_s22 = sadd.s32 1, %s189_s22  }
  0x17   : > { %s237_s25 = sadd.s32 %s33_s24, %s31_s0  ;;  %p25_p9 = scmp.ge.s32.totalorder %s28_s22, 32  }
  0x18   : > { %v43_v4 = vsel %vm39_vm0, %v35_v0, %v41_v2  ;;  %v44_v5 = vsel %vm40_vm1, %v36_v1, %v42_v3  ;;  %v45_v6 = vstv %s237_s25  ;;  %s153_s29 = scalar_lea.hbm (%p25_p9), %s264_s1, 16 }
  0x19   : > { %vm46_vm2 = vcmp.le.s32.totalorder %v43_v4, %v45_v6  ;;  %vm47_vm3 = vcmp.le.s32.totalorder %v44_v5, %v45_v6  ;;  %p154_p10 = scmp.ne.s32.totalorder (%p25_p9), %s264_s1, %s153_s29  ;;  %p157_p11 = scmp.lt.u32.totalorder (%p25_p9), %s153_s29, %s264_s1 }
  0x1a   : > { %v48_v8 = vsel %vm46_vm2, 1, %v194_v7  ;;  %v49_v9 = vsel %vm47_vm3, 1, %v194_v7 }
  0x1b   : > { %v50_v10 = vadd.s32 %v49_v9, %v48_v8  ;;  %p159_p12 = pnand (%p25_p9), %p157_p11, %p154_p10 }
  0x1d   : > { %v52_v11 = vshrl.u32 %v50_v10, 16  ;;  %v51_v12 = vand.u32 65535, %v50_v10 }
  0x1f   : > { %v54_v13 = vcvt.s32.f32 %v52_v11  ;;  %v53_v14 = vcvt.s32.f32 %v51_v12 }
  0x21   : > { %57 = vadd.xlane.f32.xlu0 %v54_v13 }
  0x25   : > { %55 = vadd.xlane.f32.xlu0 %v53_v14 }
  0xae   : > { %v58_v15 = vpop.xlane.xlu0 %57 }
  0xaf   : > { %v60_v16 = vcvt.f32.s32 %v58_v15 }
  0xb1   : > { %v61_v18 = vshll.u32 %v60_v16, 16 }
  0xb2   : > { %v56_v17 = vpop.xlane.xlu0 %55 }
  0xb3   : > { %v59_v19 = vcvt.f32.s32 %v56_v17 }
  0xb5   : > { %v62_v20 = vadd.s32 %v61_v18, %v59_v19 }
  0xb7   : > { %v63_v21 = vrot.slane %v62_v20, 4 }
  0xb9   : > { %v64_v22 = vadd.s32 %v63_v21, %v62_v20 }
  0xbb   : > { %v65_v23 = vrot.slane %v64_v22, 2 }
  0xbd   : > { %v66_v24 = vadd.s32 %v65_v23, %v64_v22 }
  0xbf   : > { %v67_v25 = vrot.slane %v66_v24, 1 }
  0xc1   : > { %v68_v26 = vadd.s32 %v67_v25, %v66_v24 }
  0xc3   : > { %100 = vpush %v68_v26 }
  0xf2   :  { %27 = sbr.rel (!%p25_p9) target bundleno = 21 (0x15), region = 36 }
  0xf4   : > { %s101_s26 = spop %100 }
  0xf5   : > { %p70_p8 = scmp.ge.s32.totalorder %s101_s26, 2046 }
  0xf7   : > { %s267_s21 = smov (!%p70_p8, %s185_s21), %s237_s25  ;;  %s269_s25 = smov (!%p70_p8, %s237_s25), %s181_s20 }
  0xf8   : > { %s265_s20 = smov %s269_s25  ;;  %74 = sst [smem:[#allocation5]] (%p25_p9), %s269_s25 }
  0xf9   :  { %162 = shalt.err (!%p159_p12)
}
  0xfa   :  { %s195_s5 = smov [#allocation5]  }
  0xfb   :  { %82 = dma.smem_to_hbm %s195_s5, 16, %s264_s1, [#allocation4]  }
  0xfc   :  { %177 = dma.done.wait [#allocation4], 16  }
  0xfd   :  { %178 = vsyncadd [#allocation4], 4294967280 }
  0xfe   :  { %86 = sfence }
  0xff   :  { %87 = vsyncpa [#allocation3], 1 }
 0x100   :  { %88 = vsyncpa [#allocation4], 1 }

</bundles_post_ra>
